<compile_context>
chip_gen: v7x
topology: tpu7x:2x2x1
jax: 0.10.0
libtpu: 0.0.40
codegen_flags: <defaults>
</compile_context>

<pallas_src>
import math

import jax
import jax.numpy as jnp
from jax.experimental import pallas as pl
from jax.experimental.pallas import tpu as pltpu


def _round_up(x, m):
    return ((x + m - 1) // m) * m


# ----------------------------------------------------------------------------
# Kernels
# ----------------------------------------------------------------------------
def _fused_kernel_single(x_ref, w_ref, b_ref, o_ref):
    """Single vocab block: bf16 matmul (f32 accumulate) + stable log-softmax."""
    logits = jnp.dot(x_ref[...].astype(jnp.bfloat16), w_ref[...],
                     preferred_element_type=jnp.float32)
    logits = logits + b_ref[...].astype(jnp.float32)
    m = jnp.max(logits, axis=-1, keepdims=True)
    shifted = logits - m
    lse = jnp.log(jnp.sum(jnp.exp(shifted), axis=-1, keepdims=True))
    o_ref[...] = (shifted - lse).astype(o_ref.dtype)


def _make_tiled_kernel(tile_v):
    """Vocab-tiled kernel: online log-sum-exp across vocab blocks."""

    def kernel(x_ref, w_ref, b_ref, o_ref, logits_ref, m_ref, s_ref):
        j = pl.program_id(1)

        @pl.when(j == 0)
        def _():
            m_ref[...] = jnp.full_like(m_ref, -jnp.inf)
            s_ref[...] = jnp.zeros_like(s_ref)

        logits = jnp.dot(x_ref[...].astype(jnp.bfloat16), w_ref[...],
                         preferred_element_type=jnp.float32)
        logits = logits + b_ref[...].astype(jnp.float32)

        # Stash this vocab slab's raw logits; normalized once at the last step.
        off = pl.multiple_of(j * tile_v, tile_v)
        logits_ref[:, pl.ds(off, tile_v)] = logits

        # Online max / sum-exp update (all f32: no bf16 VPU/EUP on v5e).
        m_old = m_ref[...]
        m_new = jnp.maximum(m_old, jnp.max(logits, axis=-1, keepdims=True))
        s_ref[...] = s_ref[...] * jnp.exp(m_old - m_new) + jnp.sum(
            jnp.exp(logits - m_new), axis=-1, keepdims=True)
        m_ref[...] = m_new

        @pl.when(j == pl.num_programs(1) - 1)
        def _():
            lse = m_ref[...] + jnp.log(s_ref[...])
            o_ref[...] = (logits_ref[...] - lse).astype(o_ref.dtype)

    return kernel


# ----------------------------------------------------------------------------
# Tiling / VMEM budgeting
# ----------------------------------------------------------------------------
def _vmem_capacity_bytes():
    try:
        return int(pltpu.get_tpu_info().vmem_capacity_bytes)
    except Exception:
        return 64 * 1024 * 1024  # conservative fallback (v7x-sized VMEM)


def _choose_tiles(N, D, V, x_itemsize, out_itemsize, budget, sublane):
    """Pick (tile_n, tile_v, padded_V, est_vmem_bytes) under a VMEM budget."""
    n_pad = _round_up(max(N, 1), sublane)
    # Keep >= 2 steps on the parallel row axis when N allows it (pipelining +
    # dual-TensorCore sharding on v7x), but never pad rows past one tile.
    cap = n_pad // 2 if n_pad // 2 >= sublane else n_pad
    cands_n = [t for t in (256, 128, 64, 32, 16, 8)
               if t % sublane == 0 and t <= cap] or [sublane]
    vp_full = _round_up(max(V, 1), 128)
    cands_v = [t for t in (16384, 8192, 4096, 2048, 1024, 512, 256, 128)
               if t < vp_full]

    def need(tile_n, tile_v):
        vp = _round_up(V, tile_v)
        nvb = vp // tile_v
        wbufs = 1 if nvb == 1 else 2                  # invariant W -> Buffered(1)
        scratch = tile_n * vp * 4 if nvb > 1 else 0   # f32 logits stash
        return (2 * tile_n * D * x_itemsize           # x row tiles (dbl-buffered)
                + wbufs * D * tile_v * 2              # bf16 weight slab(s)
                + wbufs * max(tile_v, 128) * 4        # bias slab(s)
                + scratch
                + 2 * tile_n * 128 * 4                # running max / sum-exp
                + 2 * tile_n * vp * out_itemsize)     # resident output block

    # Pass 1: whole bf16 weight resident (read from HBM exactly once).
    for tile_n in cands_n:
        nb = need(tile_n, vp_full)
        if nb <= budget:
            return tile_n, vp_full, vp_full, nb
    # Pass 2: tile the vocab axis (bounded weight slab + online LSE).
    for tile_n in cands_n:
        for tile_v in cands_v:
            nb = need(tile_n, tile_v)
            if nb <= budget:
                return tile_n, tile_v, _round_up(V, tile_v), nb
    # Fallback: smallest tiles.
    tile_n, tile_v = sublane, 128
    return tile_n, tile_v, _round_up(V, tile_v), need(tile_n, tile_v)


def _maybe_single_buffered(shape, index_map):
    """Grid-invariant block: single-buffer it to halve its VMEM footprint."""
    try:
        return pl.BlockSpec(shape, index_map, pipeline_mode=pl.Buffered(1))
    except TypeError:  # older BlockSpec signature without pipeline_mode
        return pl.BlockSpec(shape, index_map)


# ----------------------------------------------------------------------------
# Wrapper
# ----------------------------------------------------------------------------
def generator_forward(x, w, b, *, out_dtype=None):
    """log_softmax(x @ w + b, axis=-1), fused in one Pallas TPU kernel.

    x: (..., D) activations.
    w: (D, V)   projection weight, input-major (= torch nn.Linear weight.T).
    b: (V,)     projection bias.
    out_dtype: optionally emit bf16 log-probs to halve writeback bytes.
    """
    *lead, D = x.shape
    V = w.shape[1]
    if out_dtype is None:
        out_dtype = x.dtype
    N = math.prod(lead) if lead else 1
    x2d = x.reshape(N, D)

    vmem_cap = _vmem_capacity_bytes()
    budget = int(0.6 * min(vmem_cap, 128 * 1024 * 1024))
    x_item = jnp.dtype(x.dtype).itemsize
    out_item = jnp.dtype(out_dtype).itemsize
    sublane = 16 if x_item < 4 else 8  # sub-32-bit activations need (16, 128) tiles
    tile_n, tile_v, Vp, vmem_need = _choose_tiles(
        N, D, V, x_item, out_item, budget, sublane)

    # Pad rows to a tile multiple; extra rows produce log-probs that are dropped.
    Np = _round_up(N, tile_n)
    if Np != N:
        x2d = jnp.pad(x2d, ((0, Np - N), (0, 0)))

    # bf16 weights (native MXU dtype); pad vocab to a lane-dense multiple of 128.
    # Zero weight columns + very negative bias => exp underflows to 0, so padded
    # columns never perturb the log-sum-exp.
    wp = w.astype(jnp.bfloat16)
    bp = b.astype(jnp.float32).reshape(1, V)
    if Vp != V:
        wp = jnp.pad(wp, ((0, 0), (0, Vp - V)))
        bp = jnp.pad(bp, ((0, 0), (0, Vp - V)), constant_values=-1e30)

    n_row = Np // tile_n
    n_vb = Vp // tile_v
    grid = (n_row, n_vb)

    x_spec = pl.BlockSpec((tile_n, D), lambda i, j: (i, 0))
    if n_vb == 1:
        w_spec = _maybe_single_buffered((D, tile_v), lambda i, j: (0, 0))
        b_spec = _maybe_single_buffered((1, tile_v), lambda i, j: (0, 0))
        kernel = _fused_kernel_single
        scratch_shapes = []
    else:
        w_spec = pl.BlockSpec((D, tile_v), lambda i, j: (0, j))
        b_spec = pl.BlockSpec((1, tile_v), lambda i, j: (0, j))
        kernel = _make_tiled_kernel(tile_v)
        scratch_shapes = [
            pltpu.VMEM((tile_n, Vp), jnp.float32),  # raw logits stash
            pltpu.VMEM((tile_n, 1), jnp.float32),   # running max
            pltpu.VMEM((tile_n, 1), jnp.float32),   # running sum-exp
        ]
    out_spec = pl.BlockSpec((tile_n, Vp), lambda i, j: (i, 0))  # lane-dense

    cost = pl.CostEstimate(
        flops=2 * Np * D * Vp,
        transcendentals=Np * Vp,
        bytes_accessed=int(x2d.size * x_item + wp.size * 2 + bp.size * 4
                           + Np * Vp * out_item),
    )
    vmem_limit = int(min(vmem_cap, max(vmem_need + (4 << 20), 32 << 20)))

    out2d = pl.pallas_call(
        kernel,
        out_shape=jax.ShapeDtypeStruct((Np, Vp), out_dtype),
        grid=grid,
        in_specs=[x_spec, w_spec, b_spec],
        out_specs=out_spec,
        scratch_shapes=scratch_shapes,
        compiler_params=pltpu.CompilerParams(
            dimension_semantics=("parallel", "arbitrary"),
            vmem_limit_bytes=vmem_limit),
        cost_estimate=cost,
    )(x2d, wp, bp)

    out2d = out2d[:N, :V]
    return out2d.reshape(*lead, V)


# ----------------------------------------------------------------------------
# Pure-JAX reference — correctness check
# ----------------------------------------------------------------------------
def ref_generator(x, w, b):
    return jax.nn.log_softmax(x @ w + b, axis=-1)


# ----------------------------------------------------------------------------
if __name__ == "__main__":
    B, T, D, V = 2, 8, 32, 64  # batch, seq, d_model, vocab (small demo shapes)

    key = jax.random.PRNGKey(0)
    k_x, k_w, k_b = jax.random.split(key, 3)

    x = jax.random.normal(k_x, (B, T, D), jnp.float32)
    # torch nn.Linear(d_model, vocab).weight is (V, D); store transposed (D, V).
    w = (jax.random.normal(k_w, (D, V), jnp.float32) / math.sqrt(D)).astype(jnp.float32)
    b = (0.01 * jax.random.normal(k_b, (V,), jnp.float32)).astype(jnp.float32)

    out = generator_forward(x, w, b)
    out = jax.block_until_ready(out)

    ref = ref_generator(x, w, b)
    assert out.shape == (B, T, V)
    # bf16 matmul (f32 accumulate) vs. full-f32 reference: loose tolerance.
    assert jnp.allclose(out, ref, atol=5e-2, rtol=0.0), "mismatch vs JAX reference"
    # log_softmax rows must (log-)normalize to 0 — checked tightly.
    assert jnp.allclose(jax.scipy.special.logsumexp(out, axis=-1),
                        jnp.zeros((B, T)), atol=1e-4)

    print("KERNEL_OK")
</pallas_src>

<mosaic_0001>
module attributes {stable_mosaic.version = 11 : i64} {
  func.func @_fused_kernel_single(%arg0: i32, %arg1: i32, %arg2: memref<8x32xf32, #tpu.memory_space<vmem>>, %arg3: memref<32x128xbf16, #tpu.memory_space<vmem>>, %arg4: memref<1x128xf32, #tpu.memory_space<vmem>>, %arg5: memref<8x128xf32, #tpu.memory_space<vmem>>) attributes {dimension_semantics = [#tpu.dimension_semantics<parallel>, #tpu.dimension_semantics<arbitrary>], iteration_bounds = array<i64: 2, 1>, scalar_prefetch = 0 : i64, scratch_operands = 0 : i64, tpu.core_type = #tpu.core_type<tc>, window_params = [{transform_indices = @transform_0, window_bounds = array<i64: 8, 32>}, {pipeline_mode = #tpu.pipeline_mode<synchronous>, transform_indices = @transform_1, window_bounds = array<i64: 32, 128>}, {pipeline_mode = #tpu.pipeline_mode<synchronous>, transform_indices = @transform_2, window_bounds = array<i64: 1, 128>}, {transform_indices = @transform_3, window_bounds = array<i64: 8, 128>}]} {
    %c0 = arith.constant 0 : index
    %c0_0 = arith.constant 0 : index
    %0 = vector.load %arg2[%c0, %c0_0] : memref<8x32xf32, #tpu.memory_space<vmem>>, vector<8x32xf32>
    %1 = arith.truncf %0 : vector<8x32xf32> to vector<8x32xbf16>
    %c0_1 = arith.constant 0 : index
    %c0_2 = arith.constant 0 : index
    %2 = vector.load %arg3[%c0_1, %c0_2] : memref<32x128xbf16, #tpu.memory_space<vmem>>, vector<32x128xbf16>
    %cst = arith.constant dense<0.000000e+00> : vector<8x128xf32>
    %3 = tpu.matmul %1, %2, %cst {dimension_numbers = #tpu.dot_dimension_numbers<[1], [0], [0], [1], [0, 0, 1, 1], [], []>} : vector<8x32xbf16>, vector<32x128xbf16>, vector<8x128xf32> -> vector<8x128xf32>
    %c0_3 = arith.constant 0 : index
    %c0_4 = arith.constant 0 : index
    %4 = vector.load %arg4[%c0_3, %c0_4] : memref<1x128xf32, #tpu.memory_space<vmem>>, vector<1x128xf32>
    %5 = vector.broadcast %4 : vector<1x128xf32> to vector<8x128xf32>
    %6 = arith.addf %3, %5 : vector<8x128xf32>
    %cst_5 = arith.constant dense<0xFF800000> : vector<8xf32>
    %7 = vector.multi_reduction <maximumf>, %6, %cst_5 [1] : vector<8x128xf32> to vector<8xf32>
    %8 = vector.shape_cast %7 : vector<8xf32> to vector<8x1xf32>
    %9 = vector.broadcast %8 : vector<8x1xf32> to vector<8x128xf32>
    %10 = arith.subf %6, %9 : vector<8x128xf32>
    %11 = math.exp %10 : vector<8x128xf32>
    %cst_6 = arith.constant dense<0.000000e+00> : vector<8xf32>
    %12 = vector.multi_reduction <add>, %11, %cst_6 [1] : vector<8x128xf32> to vector<8xf32>
    %13 = vector.shape_cast %12 : vector<8xf32> to vector<8x1xf32>
    %14 = math.log %13 : vector<8x1xf32>
    %15 = vector.broadcast %14 : vector<8x1xf32> to vector<8x128xf32>
    %16 = arith.subf %10, %15 : vector<8x128xf32>
    %c0_7 = arith.constant 0 : index
    %c0_8 = arith.constant 0 : index
    %17 = vector.load %arg5[%c0_7, %c0_8] : memref<8x128xf32, #tpu.memory_space<vmem>>, vector<8x128xf32>
    tpu.vector_store %arg5[%c0_7, %c0_8], %16 {strides = array<i32>} : memref<8x128xf32, #tpu.memory_space<vmem>>, vector<8x128xf32>,
    return
  }
  func.func @transform_0(%arg0: i32, %arg1: i32) -> (i32, i32) {
    %c0_i32 = arith.constant 0 : i32
    %c0_i32_0 = arith.constant 0 : i32
    return %arg0, %c0_i32 : i32, i32
  }
  func.func @transform_1(%arg0: i32, %arg1: i32) -> (i32, i32) {
    %c0_i32 = arith.constant 0 : i32
    %c0_i32_0 = arith.constant 0 : i32
    %c0_i32_1 = arith.constant 0 : i32
    return %c0_i32, %c0_i32_0 : i32, i32
  }
  func.func @transform_2(%arg0: i32, %arg1: i32) -> (i32, i32) {
    %c0_i32 = arith.constant 0 : i32
    %c0_i32_0 = arith.constant 0 : i32
    %c0_i32_1 = arith.constant 0 : i32
    return %c0_i32, %c0_i32_0 : i32, i32
  }
  func.func @transform_3(%arg0: i32, %arg1: i32) -> (i32, i32) {
    %c0_i32 = arith.constant 0 : i32
    %c0_i32_0 = arith.constant 0 : i32
    return %arg0, %c0_i32 : i32, i32
  }
}

</mosaic_0001>

<bundles_post_ra>
// kernel: tpu_custom_call.1
= control target key start
LH: loop header
LB: loop body
LE: loop exit
PB: predicated region body
PF: predicated region fallthrough
CT: control target
= control target key end

     0   :  { %8 = vsyncpa [#allocation3], 0  ;;  %s900_s0 = inlined_call_operand.hbm [shape: f32[16,32], index: 0, kind: input, shape index: {}]   ;;  %s901_s1 = inlined_call_operand.hbm [shape: bf16[32,128], index: 1, kind: input, shape index: {}]   ;;  %s902_s2 = inlined_call_operand.vmem [shape: f32[1,128], index: 2, kind: input, shape index: {}]   ;;  %s903_s3 = inlined_call_operand.hbm [shape: f32[16,128], index: 3, kind: output, shape index: {}]  }
   0x1   :  { %10 = vsyncpa [#allocation3 + $0x1], 0 }
   0x2   :  { %11 = vsyncpa [#allocation6], 0 }
   0x3   :  { %12 = vsyncpa [#allocation4], 0 }
   0x4   :  { %14 = vsyncpa [#allocation4 + $0x1], 0  ;;  %s679_s12 = smov 0   ;;  %s681_s13 = smov 0  }
   0x5   :  { %s683_s14 = smov 0   ;;  %s685_s15 = smov 0  }
   0x6   :  { %s687_s16 = smov 0   ;;  %s689_s17 = smov 0  }
   0x7 LB: > { %s393_s18 = sadd.s32 4294967295, %s650_s17   ;;  %s394_s19 = sadd.s32 4294967294, %s650_s17   ;;  %s650_s17 = sphi %s689_s17, %s20_s17   ;;  %s646_s16 = sphi %s687_s16, %s927_s16   ;;  %s642_s15 = sphi %s685_s15, %s926_s15   ;;  %s638_s14 = sphi %s683_s14, %s925_s14   ;;  %s634_s13 = sphi %s681_s13, %s924_s13   ;;  %s630_s12 = sphi %s679_s12, %s923_s12  }
   0x8   : > { %p52_p0 = scmp.ne.s32.totalorder %s634_s13, %s630_s12  ;;  %p713_p1 = scmp.eq.s32.totalorder %s393_s18, 0 }
   0x9   : > { %p717_p2 = scmp.eq.s32.totalorder %s393_s18, 1  ;;  %p124_p3 = scmp.eq.s32.totalorder %s394_s19, 1 }
   0xa   : > { %s908_s20 = scalar_select %p713_p1, 1, 0 }
   0xb   : > { %s909_s21 = scalar_select %p717_p2, 1, 0 }
   0xc   : > { %p723_p4 = por %p713_p1, %p52_p0  ;;  %p395_p5 = scmp.ge.s32.totalorder %s650_s17, 1 }
   0xd   : > { %p728_p6 = por %p124_p3, %p52_p0  ;;  %p131_p7 = scmp.lt.s32.totalorder %s650_s17, 3 }
   0xe   : > { %s910_s22 = scalar_select %p723_p4, 1, 0 }
   0xf   : > { %s911_s23 = scalar_select %p728_p6, 1, 0 }
  0x10   : > { %p733_p8 = pnand %p395_p5, %p131_p7  ;;  %s652_s25 = smov [#allocation5]  }
  0x11   : > { %s143_s26 = sshll.u32 %s652_s25, 4  ;;  %s32_s28 = sadd.s32 1, %s646_s16  ;;  %s144_s26 = int_to_ptr.vmem [resolvable:$true] %s143_s26 }
  0x12   : > { %s912_s24 = scalar_select %p733_p8, 1, 0 }
  0x13   : > { %p431_p9 = pneg %p733_p8  ;;  %s506_s4 = scalar_lea.hbm %s901_s1, 256 }
  0x14   : > { %p507_p12 = scmp.ne.s32.totalorder %s901_s1, %s506_s4  ;;  %p513_p5 = scmp.lt.u32.totalorder %s506_s4, %s901_s1 }
  0x15   : > { %p742_p11 = pnand %p431_p9, %p713_p1 }
  0x17   : > { %p508_p13 = pneg %p742_p11 }
  0x19   : > { %p509_p0 = pnand %p508_p13, %p507_p12 }
  0x1b   : > { %p510_p3 = pneg %p509_p0 }
  0x1d   : > { %p515_p7 = pnand %p513_p5, %p510_p3 }
  0x1f   : > { %518 = shalt.err (!%p515_p7)
}
  0x20   : > { %s519_s9 = scalar_lea.vmem %s144_s26, 256  ;;  %p527_p1 = scmp.lt.s32.totalorder %s144_s26, %s144_s26 }
  0x21   : > { %p520_p9 = scmp.ne.s32.totalorder %s144_s26, %s519_s9  ;;  %p528_p4 = scmp.lt.s32.totalorder %s519_s9, %s519_s9 }
  0x23   : > { %p522_p10 = pnand %p520_p9, %p508_p13  ;;  %p529_p8 = por %p528_p4, %p527_p1 }
  0x25   : > { %p523_p6 = pneg %p522_p10 }
  0x27   : > { %p530_p2 = pnand %p529_p8, %p523_p6 }
  0x29   : > { %533 = shalt.err (!%p530_p2)
}
  0x2a   : > { %s653_s10 = smov 64   ;;  %s654_s11 = smov 4  }
  0x2b   : > { %434 = dma.hbm_to_vmem [thread:$0]  (!%p742_p11), %s901_s1, 256, %s144_s26, [#allocation6], %s653_s10, %s653_s10, %s654_s11  }
  0x2c   : > { %p34_p1 = scmp.ge.s32.totalorder %s32_s28, 2  ;;  %s39_s25 = sadd.s32 1, %s638_s14 }
  0x2d   : > { %p46_p2 = scmp.ne.s32.totalorder %s638_s14, %s634_s13  ;;  %p47_p4 = scmp.eq.s32.totalorder %s650_s17, 0 }
  0x2e   : > { %s929_s28 = smov (%p34_p1, %s32_s28), 0  ;;  %p915_p8 = scmp.ne.s32.totalorder %s909_s21, 0 }
  0x2f   : > { %p769_p6 = por %p47_p4, %p46_p2  ;;  %s36_s27 = ssub.s32 %s646_s16, %s929_s28 }
  0x30   : > { %p775_p10 = por %p915_p8, %p46_p2  ;;  %p444_p12 = scmp.lt.s32.totalorder %s650_s17, 2 }
  0x31   : > { %p37_p11 = scmp.eq.s32.totalorder %s36_s27, 0  ;;  %s160_s26 = sand.u32 1, %s638_s14  }
  0x32   : > { %s398_s4 = sshll.u32 %s160_s26, 3  ;;  %s399_s6 = sshll.u32 %s646_s16, 7 }
  0x33   : > { %s784_s5 = scalar_select %p37_p11, %s638_s14, %s39_s25  }
  0x34   : > { %s790_s9 = scalar_lea.hbm %s900_s0, %s399_s6  ;;  %s164_s21 = scalar_lea.vmem [#allocation2], %s398_s4 }
  0x35   : > { %s171_s10 = sshll.u32 %s164_s21, 4  ;;  %p796_p13 = pnand %p444_p12, %p769_p6  ;;  %s792_s10 = int_to_ptr.vmem [resolvable:$true] %s171_s10 }
  0x36   : > { %s161_s18 = scalar_lea.sflag [#allocation3], %s160_s26  ;;  %s534_s19 = scalar_lea.hbm %s790_s9, 128 }
  0x37   : > { %p535_p0 = scmp.ne.s32.totalorder %s790_s9, %s534_s19  ;;  %p536_p3 = pneg %p796_p13 }
  0x38   : > { %s539_s4 = scalar_lea.hbm %s900_s0, 256  ;;  %p540_p9 = scmp.lt.u32.totalorder %s790_s9, %s900_s0 }
  0x39   : > { %p537_p5 = pnand %p536_p3, %p535_p0  ;;  %p541_p1 = scmp.lt.u32.totalorder %s539_s4, %s534_s19 }
  0x3a   : > { %p543_p4 = scmp.lt.u32.totalorder %s534_s19, %s790_s9 }
  0x3b   : > { %p538_p7 = pneg %p537_p5  ;;  %p542_p2 = por %p541_p1, %p540_p9 }
  0x3d   : > { %p544_p6 = por %p543_p4, %p542_p2 }
  0x3f   : > { %p545_p8 = pnand %p544_p6, %p538_p7 }
  0x41   : > { %548 = shalt.err (!%p545_p8)
}
  0x42   : > { %s549_s26 = scalar_lea.vmem %s792_s10, 128  ;;  %s655_s7 = smov [#allocation2]  }
  0x43   : > { %p550_p12 = scmp.ne.s32.totalorder %s792_s10, %s549_s26  ;;  %s554_s8 = sshll.u32 %s655_s7, 4  ;;  %s555_s8 = int_to_ptr.vmem [resolvable:$false] %s554_s8 }
  0x44   : > { %s556_s21 = scalar_lea.vmem %s555_s8, 256  ;;  %p557_p5 = scmp.lt.s32.totalorder %s792_s10, %s555_s8 }
  0x45   : > { %p552_p11 = pnand %p550_p12, %p536_p3  ;;  %p558_p9 = scmp.lt.s32.totalorder %s556_s21, %s549_s26 }
  0x47   : > { %p553_p0 = pneg %p552_p11  ;;  %p559_p1 = por %p558_p9, %p557_p5 }
  0x49   : > { %p560_p2 = pnand %p559_p1, %p553_p0 }
  0x4b   : > { %563 = shalt.err (!%p560_p2)
}
  0x4c   : > { %438 = dma.hbm_to_vmem [thread:$0]  (!%p796_p13), %s790_s9, 128, %s792_s10, %s161_s18  }
  0x4d   : > { %p918_p7 = scmp.ne.s32.totalorder %s912_s24, 0 }
  0x4e   : > { %s828_s19 = sand.u32 (!%p918_p7), 1, %s634_s13   ;;  %p919_p3 = scmp.ne.s32.totalorder (!%p918_p7), %s910_s22, 0 }
  0x4f   : > { %180 = sbr.rel (%p918_p7) target bundleno = 641 (0x281), region = 32  ;;  %s401_s25 = sshll.u32 (!%p918_p7), %s828_s19, 3 }
  0x50   : > { %s183_s27 = scalar_lea.sflag (!%p918_p7), [#allocation3], %s828_s19  ;;  %s186_s4 = scalar_lea.vmem (!%p918_p7), [#allocation2], %s401_s25 }
  0x56   : > { %617 = dma.done.wait (%p919_p3), %s183_s27, 128  }
  0x57   : > { %619 = vsyncadd (%p919_p3), %s183_s27, 4294967168  ;;  %p920_p13 = scmp.ne.s32.totalorder %s908_s20, 0 }
  0x59   : > { %621 = dma.done.wait (%p920_p13), [#allocation6], 256  }
  0x5a   : > { %623 = vsyncadd (%p920_p13), [#allocation6], 4294967040  ;;  %v656_v0 = vmov 0.0   ;;  %vm657_vm0 = vmmov 0   ;;  %v500_v1 = vld [vmem:[#allocation5] sm:$0xff]   ;;  %v501_v2 = vld [vmem:[#allocation5 + $0x8] sm:$0xff]  }
  0x5b   : > { %415 = vmatprep.subr.bf16.mxu0 %v656_v0  ;;  %419 = vmatprep.mubr.msk.bf16.mxu0 %vm657_vm0, %v656_v0  ;;  %v214_v3 = vld [vmem:[%s186_s4] sm:$0xff]  ;;  %vm239_vm1 = vcmask 261120   ;;  %s409_s20 = sshll.u32 %s642_s15, 7  ;;  %s212_s9 = scalar_lea.vmem [#allocation7], %s401_s25 }
  0x5c   : > { %416 = vmatpush3.bf16.msra.mxu0 %v500_v1  ;;  %v215_v4 = vpack.c.bf16 %v214_v3, %v214_v3  ;;  %v404_v5 = vld [vmem:[%s902_s2] ss:$0 sm:$0xff]  ;;  %s308_s10 = sshll.u32 %s212_s9, 4  ;;  %s851_s29 = scalar_lea.hbm %s903_s3, %s409_s20  ;;  %s853_s10 = int_to_ptr.vmem [resolvable:$true] %s308_s10 }
  0x5d   : > { %417 = vmatprep.subr.bf16.mxu0 %v656_v0  ;;  %s295_s6 = scalar_lea.sflag [#allocation4], %s828_s19  ;;  %s564_s26 = scalar_lea.vmem %s853_s10, 128 }
  0x5e   : > { %p565_p4 = scmp.ne.s32.totalorder %s853_s10, %s564_s26  ;;  %s658_s15 = smov [#allocation7]  }
  0x5f   : > { %s568_s7 = sshll.u32 %s658_s15, 4  ;;  %s569_s7 = int_to_ptr.vmem [resolvable:$false] %s568_s7 }
  0x60   : > { %418 = vmatpush3.bf16.msra.mxu0 %v501_v2  ;;  %p566_p6 = pnand %p565_p4, %p775_p10  ;;  %s570_s8 = scalar_lea.vmem %s569_s7, 256 }
  0x61   : > { %p571_p12 = scmp.lt.s32.totalorder %s853_s10, %s569_s7  ;;  %p572_p11 = scmp.lt.s32.totalorder %s570_s8, %s564_s26 }
  0x62   : > { %p567_p8 = pneg %p566_p6 }
  0x63   : > { %420 = vmatmul.mubr.msk.bf16.vlgmr.msra.gmra.mrb[0].mxu0 %vm239_vm1, %v215_v4  ;;  %p573_p0 = por %p572_p11, %p571_p12 }
  0x65   : > { %p574_p5 = pnand %p573_p0, %p567_p8 }
 0x136   : > { %v277_v6 = vpop.f32.mrb[0].mxu0 }
 0x137   : > { %v278_v7 = vadd.f32 %v404_v5, %v277_v6  ;;  %v421_v8 = vpop.f32.mrb[1].mxu0 }
 0x138   : > { %v280_v9 = vpop.f32.mrb[2].mxu0 }
 0x139   : > { %283 = vmax.xlane.f32.xlu0 %v278_v7  ;;  %v422_v10 = vpop.f32.mrb[3].mxu0 }
 0x1c6   : > { %v284_v11 = vpop.xlane.xlu0 %283 }
 0x1c7   : > { %v285_v12 = vsub.f32 %v278_v7, %v284_v11 }
 0x1c9   : > { %v286_v13 = vmul.f32 1.442695, %v285_v12 }
 0x1cb   : > { %502 = vpow2.f32 %v286_v13 }
 0x1d5   : > { %v503_v14 = vpop.eup %502 }
 0x1d6   : > { %288 = vadd.xlane.f32.xlu0 %v503_v14 }
 0x263   : > { %v289_v15 = vpop.xlane.xlu0 %288 }
 0x264   : > { %504 = vlog2.f32 %v289_v15 }
 0x26e   : > { %v505_v16 = vpop.eup %504 }
 0x26f   : > { %v291_v17 = vmul.f32 0.6931472, %v505_v16 }
 0x271   : > { %v292_v18 = vsub.f32 %v285_v12, %v291_v17 }
 0x273   : > { %293 = vst [vmem:[%s212_s9] sm:$0xff] %v292_v18 }
 0x274   : > { %577 = shalt.err (!%p574_p5)
}
 0x275   : > { %s578_s21 = scalar_lea.hbm %s851_s29, 128  ;;  %s582_s27 = scalar_lea.hbm %s903_s3, 256 }
 0x276   : > { %p579_p9 = scmp.ne.s32.totalorder %s851_s29, %s578_s21  ;;  %p583_p7 = scmp.lt.u32.totalorder %s851_s29, %s903_s3 }
 0x277   : > { %p584_p3 = scmp.lt.u32.totalorder %s582_s27, %s578_s21  ;;  %p586_p4 = scmp.lt.u32.totalorder %s578_s21, %s851_s29 }
 0x278   : > { %p580_p1 = pnand %p579_p9, %p775_p10 }
 0x279   : > { %p585_p13 = por %p584_p3, %p583_p7 }
 0x27a   : > { %p581_p2 = pneg %p580_p1 }
 0x27b   : > { %p587_p6 = por %p586_p4, %p585_p13 }
 0x27d   : > { %p588_p8 = pnand %p587_p6, %p581_p2 }
 0x27f   : > { %591 = shalt.err (!%p588_p8)
}
 0x280   : > { %429 = dma.vmem_to_hbm [thread:$0]  (%p775_p10), %s853_s10, 128, %s851_s29, %s295_s6  }
 0x281 PF: > { %s320_s24 = sand.u32 1, %s630_s12   ;;  %p921_p12 = scmp.ne.s32.totalorder %s911_s23, 0 }
 0x282   : > { %p922_p11 = scmp.ge.s32.totalorder %s650_s17, 2  ;;  %s321_s20 = scalar_lea.sflag [#allocation4], %s320_s24 }
 0x284   : > { %p440_p0 = pnand %p922_p11, %p921_p12 }
 0x286   : > { %625 = dma.done.wait (!%p440_p0), %s321_s20, 128  }
 0x287   : > { %627 = vsyncadd (!%p440_p0), %s321_s20, 4294967168  ;;  %s20_s17 = sadd.s32 1, %s650_s17   ;;  %s923_s12 = smov %s634_s13 }
 0x288   : > { %p17_p5 = scmp.ge.s32.totalorder %s20_s17, 4   ;;  %s924_s13 = smov %s638_s14 }
 0x289   : > { %s925_s14 = smov %s784_s5  ;;  %s926_s15 = smov %s646_s16 }
 0x28a   : > { %s927_s16 = smov %s929_s28  ;;  %19 = sbr.rel (!%p17_p5) target bundleno = 7 (0x7), region = 81 }
 0x291   :  { %326 = vsyncpa [#allocation3], 1 }
 0x292   :  { %328 = vsyncpa [#allocation3 + $0x1], 1 }
 0x293   :  { %329 = vsyncpa [#allocation6], 1 }
 0x294   :  { %330 = vsyncpa [#allocation4], 1 }
 0x295   :  { %332 = vsyncpa [#allocation4 + $0x1], 1 }

</bundles_post_ra>
